<compile_context>
chip_gen: v7x
topology: tpu7x:2x2x1
jax: 0.10.0
libtpu: 0.0.40
codegen_flags: <defaults>
</compile_context>

<pallas_src>
import jax
import jax.numpy as jnp
import numpy as np
from jax import lax
from jax.experimental import pallas as pl
from jax.experimental.pallas import tpu as pltpu

# special tokens (as in the original script's `special_tokens` dict)
SOP_ID, HAM_ID, SPAM_ID = 1, 2, 3

ENCODER_WEIGHT = 0.5                    # encoder_weight=0.5 (default)
DECODER_WEIGHT = 1.0 - ENCODER_WEIGHT   # decoder_weight = 1 - encoder_weight

NUM_LANES = 128          # TPU vreg lane width
LANE_ENC = 2             # lanes 2-3: encoder (HAM, SPAM) probabilities
LANE_DEC = 4             # lanes 4-5: decoder (HAM, SPAM) probabilities
                         # lanes 0-1: weighted-average ensemble probabilities

# TODO(synk): 'voting' and 'meta_learner' ensemble branches are not implemented;
#             this kernel covers the default ensemble_method='weighted_average'.
# TODO(synk): at production sizes the frozen sub-model embedding gather/pooling
#             could also be fused into the kernel via scalar-prefetched manual
#             DMA gathers; it is kept in XLA here (frozen black-box glue).


def _round_up(x, m):
    return (x + m - 1) // m * m


def ensemble_head_kernel(x_ref, w_ref, out_ref):
    """Fused encoder/decoder heads + two 2-class softmaxes + weighted ensemble.

    x_ref : (TB, Kp)   rows = [enc_pooled | sop_hidden*valid | valid | 1 | 0pad]
    w_ref : (Kp, 128)  lane-dense "difference head" (see build_fused_head)
    out   : (TB, 128)  lanes 0-1 ensemble, 2-3 encoder, 4-5 decoder probs
    """
    # d[:, c] = logit(other class) - logit(class c); 0 on unused lanes.
    d = jnp.dot(x_ref[...], w_ref[...], preferred_element_type=jnp.float32)
    # Two-class softmax, fully elementwise: p_c = 1 / (1 + exp(l_other - l_c)).
    p = pl.reciprocal(1.0 + jnp.exp(d), approx=True)             # (TB, 128)
    # Rotate the encoder / decoder prob pairs onto lanes 0-1 (XLU, full vreg).
    enc_at0 = pltpu.roll(p, shift=NUM_LANES - LANE_ENC, axis=1)
    dec_at0 = pltpu.roll(p, shift=NUM_LANES - LANE_DEC, axis=1)
    lane = lax.broadcasted_iota(jnp.int32, p.shape, 1)
    out_ref[...] = jnp.where(
        lane < 2, ENCODER_WEIGHT * enc_at0 + DECODER_WEIGHT * dec_at0, p)


def build_fused_head(params):
    """Pack both 2-class heads into one lane-dense (Kp, 128) difference slab."""
    w_enc = params["w_enc"]            # (D, 2)
    b_enc = params["b_enc"][0]         # (2,)
    w_dec = params["w_dec"]            # (D, V)
    b_dec = params["b_dec"][0]         # (V,)
    D = w_enc.shape[0]
    K = 2 * D + 2                      # enc feats | dec feats | valid | const 1
    Kp = _round_up(K, NUM_LANES)

    enc_d = w_enc[:, 1] - w_enc[:, 0]                     # l1 - l0 weights
    dec_d = w_dec[:, SPAM_ID] - w_dec[:, HAM_ID]
    b_enc_d = b_enc[1] - b_enc[0]
    b_dec_d = b_dec[SPAM_ID] - b_dec[HAM_ID]

    w = jnp.zeros((Kp, NUM_LANES), jnp.float32)
    w = w.at[0:D, LANE_ENC].set(enc_d)
    w = w.at[0:D, LANE_ENC + 1].set(-enc_d)
    w = w.at[D:2 * D, LANE_DEC].set(dec_d)
    w = w.at[D:2 * D, LANE_DEC + 1].set(-dec_d)
    w = w.at[2 * D, LANE_DEC].set(b_dec_d)        # gated by the `valid` column
    w = w.at[2 * D, LANE_DEC + 1].set(-b_dec_d)
    w = w.at[2 * D + 1, LANE_ENC].set(b_enc_d)    # constant-1 column (enc bias)
    w = w.at[2 * D + 1, LANE_ENC + 1].set(-b_enc_d)
    return w, Kp


def init_params(key, vocab, dim):
    ks = jax.random.split(key, 6)
    scale = 0.1
    return {
        "enc_embed": scale * jax.random.normal(ks[0], (vocab, dim), jnp.float32),
        "w_enc":     scale * jax.random.normal(ks[1], (dim, 2), jnp.float32),
        "b_enc":     scale * jax.random.normal(ks[2], (1, 2), jnp.float32),
        "dec_embed": scale * jax.random.normal(ks[3], (vocab, dim), jnp.float32),
        "w_dec":     scale * jax.random.normal(ks[4], (dim, vocab), jnp.float32),
        "b_dec":     scale * jax.random.normal(ks[5], (1, vocab), jnp.float32),
    }


def stacked_ensemble_forward(encoder_input_ids, decoder_input_ids, params):
    B, S = decoder_input_ids.shape

    # ---- frozen synthetic sub-models (glue; plain JAX / XLA) ----
    enc_emb = jnp.take(params["enc_embed"], encoder_input_ids, axis=0)   # (B,S,D)
    enc_pooled = jnp.mean(enc_emb, axis=1)                               # (B,D)
    dec_emb = jnp.take(params["dec_embed"], decoder_input_ids, axis=0)   # (B,S,D)
    # synthetic "decoder": causal mean of token embeddings (frozen black box)
    dec_hidden = (jnp.cumsum(dec_emb, axis=1)
                  / jnp.arange(1, S + 1, dtype=jnp.float32)[None, :, None])

    # ---- first <SOP> position / validity (scalar work; stays in wrapper) ----
    is_sop = decoder_input_ids == SOP_ID
    has_sop = jnp.any(is_sop, axis=1)
    first_pos = jnp.argmax(is_sop, axis=1)                               # (B,)
    valid = (has_sop & (first_pos < S - 1)).astype(jnp.float32)          # (B,)
    # gather ONLY the one needed hidden state per row — no (B,S,V) logits.
    sop_hidden = jnp.take_along_axis(
        dec_hidden, first_pos[:, None, None], axis=1)[:, 0, :]           # (B,D)
    sop_hidden = sop_hidden * valid[:, None]

    # ---- lane-dense fused head + fused kernel input ----
    w_fused, Kp = build_fused_head(params)
    x = jnp.concatenate(
        [enc_pooled, sop_hidden, valid[:, None], jnp.ones((B, 1), jnp.float32)],
        axis=-1)                                                         # (B, 2D+2)
    x = jnp.pad(x, ((0, 0), (0, Kp - x.shape[1])))                       # (B, Kp)

    # batch tiling: sublane-aligned blocks, batch axis marked 'parallel'
    TB = 256 if B >= 256 else _round_up(B, 8)
    Bp = _round_up(B, TB)
    x = jnp.pad(x, ((0, Bp - B), (0, 0)))

    out = pl.pallas_call(
        ensemble_head_kernel,
        out_shape=jax.ShapeDtypeStruct((Bp, NUM_LANES), jnp.float32),
        grid=(Bp // TB,),
        in_specs=[
            pl.BlockSpec((TB, Kp), lambda i: (i, 0)),
            pl.BlockSpec((Kp, NUM_LANES), lambda i: (0, 0)),   # weight resident
        ],
        out_specs=pl.BlockSpec((TB, NUM_LANES), lambda i: (i, 0)),
        compiler_params=pltpu.CompilerParams(
            dimension_semantics=("parallel",)),
    )(x, w_fused)

    ensemble_probs = out[:B, 0:2]
    encoder_probs = out[:B, LANE_ENC:LANE_ENC + 2]
    decoder_probs = out[:B, LANE_DEC:LANE_DEC + 2]
    return ensemble_probs, encoder_probs, decoder_probs


def reference_forward(encoder_input_ids, decoder_input_ids, params):
    """Pure-JAX/NumPy reference mirroring the PyTorch forward semantics."""
    enc_emb = jnp.take(params["enc_embed"], encoder_input_ids, axis=0)
    pooled = jnp.mean(enc_emb, axis=1)
    enc_logits = pooled @ params["w_enc"] + params["b_enc"]
    enc_probs = jax.nn.softmax(enc_logits, axis=-1)

    B, S = decoder_input_ids.shape
    dec_emb = jnp.take(params["dec_embed"], decoder_input_ids, axis=0)
    dec_hidden = (jnp.cumsum(dec_emb, axis=1)
                  / jnp.arange(1, S + 1, dtype=jnp.float32)[None, :, None])
    dec_logits = (jnp.einsum("bsd,dv->bsv", dec_hidden, params["w_dec"])
                  + params["b_dec"][0])

    cls = np.zeros((B, 2), np.float32)
    ids_np = np.asarray(decoder_input_ids)
    dl_np = np.asarray(dec_logits)
    for i in range(B):
        pos = np.nonzero(ids_np[i] == SOP_ID)[0]
        if len(pos) > 0 and pos[0] < S - 1:
            cls[i, 0] = dl_np[i, pos[0], HAM_ID]
            cls[i, 1] = dl_np[i, pos[0], SPAM_ID]
    dec_probs = jax.nn.softmax(jnp.asarray(cls), axis=-1)
    ens = ENCODER_WEIGHT * enc_probs + DECODER_WEIGHT * dec_probs
    return ens, enc_probs, dec_probs


if __name__ == "__main__":
    B, S, V, D = 4, 8, 32, 16

    key = jax.random.PRNGKey(0)
    k_par, k_enc, k_dec = jax.random.split(key, 3)
    params = init_params(k_par, V, D)

    encoder_input_ids = jax.random.randint(k_enc, (B, S), 4, V, dtype=jnp.int32)
    decoder_input_ids = jax.random.randint(k_dec, (B, S), 4, V, dtype=jnp.int32)
    # place <SOP> tokens deterministically: rows 0-2 get a valid <SOP>,
    # row 3 has none (exercises the zero-logits -> [0.5, 0.5] branch).
    decoder_input_ids = decoder_input_ids.at[0, 2].set(SOP_ID)
    decoder_input_ids = decoder_input_ids.at[1, 5].set(SOP_ID)
    decoder_input_ids = decoder_input_ids.at[2, 0].set(SOP_ID)

    forward = jax.jit(stacked_ensemble_forward)
    outs = forward(encoder_input_ids, decoder_input_ids, params)
    outs = jax.block_until_ready(outs)

    refs = reference_forward(encoder_input_ids, decoder_input_ids, params)
    # tolerance accounts for approx reciprocal (EUP) + default matmul precision
    for o, r in zip(outs, refs):
        np.testing.assert_allclose(np.asarray(o), np.asarray(r),
                                   atol=2e-3, rtol=1e-2)

    print("KERNEL_OK")
</pallas_src>

<mosaic_0001>
module attributes {stable_mosaic.version = 11 : i64} {
  func.func @ensemble_head_kernel(%arg0: i32, %arg1: memref<8x128xf32, #tpu.memory_space<vmem>>, %arg2: memref<128x128xf32, #tpu.memory_space<vmem>>, %arg3: memref<8x128xf32, #tpu.memory_space<vmem>>) attributes {dimension_semantics = [#tpu.dimension_semantics<parallel>], iteration_bounds = array<i64: 1>, scalar_prefetch = 0 : i64, scratch_operands = 0 : i64, tpu.core_type = #tpu.core_type<tc>, window_params = [{transform_indices = @transform_0, window_bounds = array<i64: 8, 128>}, {pipeline_mode = #tpu.pipeline_mode<synchronous>, transform_indices = @transform_1, window_bounds = array<i64: 128, 128>}, {transform_indices = @transform_2, window_bounds = array<i64: 8, 128>}]} {
    %c0 = arith.constant 0 : index
    %c0_0 = arith.constant 0 : index
    %0 = vector.load %arg1[%c0, %c0_0] : memref<8x128xf32, #tpu.memory_space<vmem>>, vector<8x128xf32>
    %c0_1 = arith.constant 0 : index
    %c0_2 = arith.constant 0 : index
    %1 = vector.load %arg2[%c0_1, %c0_2] : memref<128x128xf32, #tpu.memory_space<vmem>>, vector<128x128xf32>
    %cst = arith.constant dense<0.000000e+00> : vector<8x128xf32>
    %2 = tpu.matmul %0, %1, %cst {dimension_numbers = #tpu.dot_dimension_numbers<[1], [0], [0], [1], [0, 0, 1, 1], [], []>} : vector<8x128xf32>, vector<128x128xf32>, vector<8x128xf32> -> vector<8x128xf32>
    %3 = math.exp %2 : vector<8x128xf32>
    %cst_3 = arith.constant 1.000000e+00 : f32
    %4 = vector.broadcast %cst_3 : f32 to vector<8x128xf32>
    %5 = arith.addf %4, %3 : vector<8x128xf32>
    %6 = tpu.reciprocal %5 {approx = true} : vector<8x128xf32> -> vector<8x128xf32>
    %c126_i32 = arith.constant 126 : i32
    %7 = tpu.dynamic_rotate %6 by %c126_i32 dim 1 : vector<8x128xf32>, i32 -> vector<8x128xf32>
    %c124_i32 = arith.constant 124 : i32
    %8 = tpu.dynamic_rotate %6 by %c124_i32 dim 1 : vector<8x128xf32>, i32 -> vector<8x128xf32>
    %9 = tpu.iota {dimensions = array<i32: 1>} : vector<8x128xi32>
    %c2_i32 = arith.constant 2 : i32
    %10 = vector.broadcast %c2_i32 : i32 to vector<8x128xi32>
    %11 = arith.cmpi slt, %9, %10 : vector<8x128xi32>
    %cst_4 = arith.constant 5.000000e-01 : f32
    %12 = vector.broadcast %cst_4 : f32 to vector<8x128xf32>
    %13 = arith.mulf %12, %7 : vector<8x128xf32>
    %cst_5 = arith.constant 5.000000e-01 : f32
    %14 = vector.broadcast %cst_5 : f32 to vector<8x128xf32>
    %15 = arith.mulf %14, %8 : vector<8x128xf32>
    %16 = arith.addf %13, %15 : vector<8x128xf32>
    %17 = arith.select %11, %16, %6 : vector<8x128xi1>, vector<8x128xf32>
    %c0_6 = arith.constant 0 : index
    %c0_7 = arith.constant 0 : index
    %18 = vector.load %arg3[%c0_6, %c0_7] : memref<8x128xf32, #tpu.memory_space<vmem>>, vector<8x128xf32>
    tpu.vector_store %arg3[%c0_6, %c0_7], %17 {strides = array<i32>} : memref<8x128xf32, #tpu.memory_space<vmem>>, vector<8x128xf32>,
    return
  }
  func.func @transform_0(%arg0: i32) -> (i32, i32) {
    %c0_i32 = arith.constant 0 : i32
    %c0_i32_0 = arith.constant 0 : i32
    return %arg0, %c0_i32 : i32, i32
  }
  func.func @transform_1(%arg0: i32) -> (i32, i32) {
    %c0_i32 = arith.constant 0 : i32
    %c0_i32_0 = arith.constant 0 : i32
    %c0_i32_1 = arith.constant 0 : i32
    return %c0_i32, %c0_i32_0 : i32, i32
  }
  func.func @transform_2(%arg0: i32) -> (i32, i32) {
    %c0_i32 = arith.constant 0 : i32
    %c0_i32_0 = arith.constant 0 : i32
    return %arg0, %c0_i32 : i32, i32
  }
}

</mosaic_0001>

<bundles_post_ra>
// kernel: stacked_ensemble_forward.1
= control target key start
LH: loop header
LB: loop body
LE: loop exit
PB: predicated region body
PF: predicated region fallthrough
CT: control target
= control target key end

     0   :  { %v203_v0 = vmov 0.0|0.0   ;;  %vm204_vm0 = vmmov 0   ;;  %v205_v4 = vmov 0.0   ;;  %s206_s15 = smov 126   ;;  %v106_v33 = vlaneseq  ;;  %s277_s1 = inlined_call_operand.vmem [shape: f32[128,128], index: 1, kind: input, shape index: {}]   ;;  %s278_s0 = inlined_call_operand.vmem [shape: f32[8,128], index: 0, kind: input, shape index: {}]   ;;  %s279_s2 = inlined_call_operand.vmem [shape: f32[8,128], index: 2, kind: output, shape index: {}]  }
   0x1   :  { %170 = vmatprep.subr.bf16.mxu0 %v203_v0  ;;  %v12_v1 = vld [vmem:[%s277_s1] sm:$0xff]  ;;  %v13_v2 = vld [vmem:[%s277_s1 + $0x8] sm:$0xff]  ;;  %v14_v3 = vld [vmem:[%s277_s1 + $0x10] sm:$0xff]  ;;  %167 = vmatprep.mubr.msk.f32.mxu0 %vm204_vm0, %v205_v4 }
   0x2   :  { %v171_v5 = vpack.c.bf16 %v13_v2, %v12_v1  ;;  %v15_v6 = vld [vmem:[%s277_s1 + $0x18] sm:$0xff]  ;;  %v16_v8 = vld [vmem:[%s277_s1 + $0x20] sm:$0xff]  ;;  %v17_v9 = vld [vmem:[%s277_s1 + $0x28] sm:$0xff]  ;;  %v107_v35 = vand.u32 127, %v106_v33 }
   0x3   :  { %v174_v7 = vpack.c.bf16 %v15_v6, %v14_v3  ;;  %v177_v10 = vpack.c.bf16 %v17_v9, %v16_v8  ;;  %v18_v11 = vld [vmem:[%s277_s1 + $0x30] sm:$0xff]  ;;  %v19_v12 = vld [vmem:[%s277_s1 + $0x38] sm:$0xff]  ;;  %v20_v14 = vld [vmem:[%s277_s1 + $0x40] sm:$0xff] }
   0x4   :  { %172 = vmatpush3.bf16.msra.mxu0 %v171_v5  ;;  %v180_v13 = vpack.c.bf16 %v19_v12, %v18_v11  ;;  %v21_v15 = vld [vmem:[%s277_s1 + $0x48] sm:$0xff]  ;;  %v22_v17 = vld [vmem:[%s277_s1 + $0x50] sm:$0xff]  ;;  %v23_v18 = vld [vmem:[%s277_s1 + $0x58] sm:$0xff]  ;;  %vm108_vm1 = vcmp.lt.s32.totalorder %v107_v35, 2 }
   0x5   :  { %173 = vmatprep.subr.bf16.mxu0 %v203_v0  ;;  %v183_v16 = vpack.c.bf16 %v21_v15, %v20_v14  ;;  %v186_v19 = vpack.c.bf16 %v23_v18, %v22_v17  ;;  %v24_v20 = vld [vmem:[%s277_s1 + $0x60] sm:$0xff]  ;;  %v25_v21 = vld [vmem:[%s277_s1 + $0x68] sm:$0xff]  ;;  %v26_v23 = vld [vmem:[%s277_s1 + $0x70] sm:$0xff] }
   0x6   :  { %v189_v22 = vpack.c.bf16 %v25_v21, %v24_v20  ;;  %v27_v24 = vld [vmem:[%s277_s1 + $0x78] sm:$0xff]  ;;  %v11_v26 = vld [vmem:[%s278_s0] sm:$0xff]  ;;  %s207_s1 = smov 124  }
   0x7   :  { %v192_v25 = vpack.c.bf16 %v27_v24, %v26_v23 }
   0x8   :  { %175 = vmatpush3.bf16.msra.mxu0 %v174_v7 }
   0x9   :  { %176 = vmatprep.subr.bf16.mxu0 %v203_v0 }
   0xc   :  { %178 = vmatpush3.bf16.msra.mxu0 %v177_v10 }
   0xd   :  { %179 = vmatprep.subr.bf16.mxu0 %v203_v0 }
  0x10   :  { %181 = vmatpush3.bf16.msra.mxu0 %v180_v13 }
  0x11   :  { %182 = vmatprep.subr.bf16.mxu0 %v203_v0 }
  0x14   :  { %184 = vmatpush3.bf16.msra.mxu0 %v183_v16 }
  0x15   :  { %185 = vmatprep.subr.bf16.mxu0 %v203_v0 }
  0x18   :  { %187 = vmatpush3.bf16.msra.mxu0 %v186_v19 }
  0x19   :  { %188 = vmatprep.subr.bf16.mxu0 %v203_v0 }
  0x1c   :  { %190 = vmatpush3.bf16.msra.mxu0 %v189_v22 }
  0x1d   :  { %191 = vmatprep.subr.bf16.mxu0 %v203_v0 }
  0x20   :  { %193 = vmatpush3.bf16.msra.mxu0 %v192_v25 }
  0x23   :  { %168 = vmatmul.mubr.f32.vlgmr.msra.gmra.mrb[0].mxu0 %v11_v26 }
  0xf6   :  { %v94_v27 = vpop.f32.mrb[0].mxu0 }
  0xf7   :  { %v98_v28 = vmul.f32 1.442695, %v94_v27  ;;  %v169_v29 = vpop.f32.mrb[1].mxu0 }
  0xf9   :  { %199 = vpow2.f32 %v98_v28 }
 0x103   :  { %v200_v30 = vpop.eup %199 }
 0x104   :  { %v100_v31 = vadd.f32 1.0, %v200_v30 }
 0x106   :  { %201 = vrcp.f32 %v100_v31 }
 0x110   :  { %v202_v32 = vpop.eup %201 }
 0x111   :  { %102 = vrot.lane.b32.xlu0 %v202_v32, %s206_s15 }
 0x115   :  { %104 = vrot.lane.b32.xlu0 %v202_v32, %s207_s1 }
 0x183   :  { %v103_v34 = vpop.permute.xlu0 %102 }
 0x184   :  { %v109_v37 = vmul.f32 0.5, %v103_v34 }
 0x187   :  { %v105_v36 = vpop.permute.xlu0 %104 }
 0x188   :  { %v110_v38 = vmul.f32 0.5, %v105_v36 }
 0x18a   :  { %v111_v39 = vadd.f32 %v110_v38, %v109_v37 }
 0x18c   :  { %v112_v40 = vsel %vm108_vm1, %v111_v39, %v202_v32 }
 0x18d   :  { %113 = vst [vmem:[%s279_s2] sm:$0xff] %v112_v40 }

</bundles_post_ra>
